<compile_context>
chip_gen: v7x
topology: tpu7x:2x2x1
jax: 0.10.0
libtpu: 0.0.40
codegen_flags: <defaults>
</compile_context>

<pallas_src>
import math

import jax
import jax.numpy as jnp
from jax.experimental import pallas as pl
from jax.experimental.pallas import tpu as pltpu

d_k = 64  # matches the PyTorch module's global

_VMEM_TILE_BUDGET = 30 * 1024 * 1024   # conservative vs. v7x's 64 MiB/TC VMEM
_VMEM_LIMIT_BYTES = 40 * 1024 * 1024


def _sdpa_kernel(q_ref, k_ref, v_ref, mask_ref, ctx_ref, w_ref):
    scale = 1.0 / math.sqrt(d_k)

    # bf16 MXU operands (f32 accumulate) when inputs arrive as f32.
    mxu_dtype = jnp.bfloat16 if q_ref.dtype == jnp.float32 else q_ref.dtype

    q = (q_ref[...].astype(jnp.float32) * scale).astype(mxu_dtype)   # [hb, tq, Dk]
    k = k_ref[...].astype(mxu_dtype)                                  # [hb, Sk, Dk]
    m = mask_ref[...]                                                 # [tq, Sk] or [hb, tq, Sk] int8

    # Q K^T: batched dot_general contracting the last axes (no k.T / XLU transpose).
    scores = jnp.einsum("hqd,hkd->hqk", q, k,
                        preferred_element_type=jnp.float32)           # [hb, tq, Sk] f32

    # Numerically-stable softmax along the key axis; mask by zeroing AFTER the exp
    # (masked entries would be exp(-1e9 - max) == 0 anyway).
    s_max = jnp.max(scores, axis=-1, keepdims=True)
    e = jnp.exp(scores - s_max)
    e = jnp.where(m != 0, 0.0, e)
    denom = jnp.sum(e, axis=-1, keepdims=True)
    weights = e * pl.reciprocal(denom, approx=True)                   # divide -> EUP

    v = v_ref[...].astype(mxu_dtype)
    ctx = jnp.einsum("hqk,hkd->hqd", weights.astype(mxu_dtype), v,
                     preferred_element_type=jnp.float32)              # [hb, tq, Dv]

    ctx_ref[...] = ctx.astype(ctx_ref.dtype)
    w_ref[...] = weights.astype(w_ref.dtype)


def _step_vmem_bytes(hb, tq, Sk, Dk, Dv, itemsize, mask_shared):
    """Rough VMEM bytes per grid step: double-buffered blocks + live f32 score slabs."""
    mb = 1 if mask_shared else hb
    io = 2 * itemsize * hb * (tq * Dk + Sk * Dk + Sk * Dv + tq * Dv + tq * Sk)
    io += 2 * mb * tq * Sk                      # int8 mask blocks
    slabs = 3 * hb * tq * Sk * 4                # scores / exp / weights intermediates
    return io + slabs


def _pick_tiles(BH, Sq, Sk, Dk, Dv, itemsize, mask_shared):
    """Choose (heads-per-block, q-tile): MXU-row friendly, VMEM-bounded, grid >= 2 steps."""

    def fits(hb, tq):
        return _step_vmem_bytes(hb, tq, Sk, Dk, Dv, itemsize, mask_shared) <= _VMEM_TILE_BUDGET

    # q tile: prefer 256 (fills v6e/v7x MXU) then 128 (v5e); shrink further only when the
    # dense [tq, Sk] f32 score slab would blow the VMEM budget (very long Sk).
    tq = Sq  # fallback: whole (small / irregular) sequence as one q block
    for cand in (256, 128, 64, 32, 16, 8):
        if Sq % cand == 0 and (fits(1, cand) or cand == 8):
            tq = cand
            break

    # Heads per block: amortize the ~0.35us per-step overhead for tiny q tiles, but never
    # collapse the batch/head grid axis below 2 steps (v7x has 2 TensorCores) and stay in
    # the VMEM budget.  (hb does NOT enlarge the per-matmul M; it only batches matmuls.)
    hb = 1
    if tq < 128 and BH > 1:
        max_hb = max(1, BH // 2)
        target = max(1, 256 // max(tq, 1))
        for cand in range(min(target, max_hb), 0, -1):
            if BH % cand == 0 and fits(cand, tq):
                hb = cand
                break
    return hb, tq


def scaled_dot_product_attention(Q, K, V, attn_mask):
    """Q,K,V: [B,H,S,d]; attn_mask: broadcastable to [B,H,Sq,Sk], nonzero/True => masked."""
    B, H, Sq, Dk = Q.shape
    Sk = K.shape[2]
    Dv = V.shape[3]
    BH = B * H
    out_dtype = Q.dtype
    itemsize = jnp.dtype(out_dtype).itemsize

    q = Q.reshape(BH, Sq, Dk)
    k = K.reshape(BH, Sk, Dk)
    v = V.reshape(BH, Sk, Dv)

    # Mask: boolean semantics (nonzero == masked).  If it broadcasts over batch & heads
    # (typical causal mask), keep a single [Sq, Sk] int8 plane -> no BH-duplicated HBM read.
    a = jnp.asarray(attn_mask)
    mask_shared = a.ndim <= 2 or all(int(d) == 1 for d in a.shape[:-2])
    if mask_shared:
        plane = a.reshape(a.shape[-2:]) if a.ndim > 2 else a
        mask = jnp.broadcast_to(plane != 0, (Sq, Sk)).astype(jnp.int8)
    else:
        mask = (jnp.broadcast_to(a, (B, H, Sq, Sk)) != 0).reshape(BH, Sq, Sk).astype(jnp.int8)

    hb, tq = _pick_tiles(BH, Sq, Sk, Dk, Dv, itemsize, mask_shared)
    # q-tile axis innermost so the K/V block index is constant across consecutive steps
    # and Pallas skips their re-DMA.
    grid = (BH // hb, Sq // tq)

    if mask_shared:
        mask_spec = pl.BlockSpec((tq, Sk), lambda b, qi: (qi, 0))          # ignores bh axis
    else:
        mask_spec = pl.BlockSpec((hb, tq, Sk), lambda b, qi: (b, qi, 0))

    cost = pl.CostEstimate(
        flops=2 * BH * Sq * Sk * (Dk + Dv),
        transcendentals=BH * Sq * Sk,
        bytes_accessed=(BH * (Sq * Dk + Sk * Dk + Sk * Dv) * itemsize   # Q, K, V reads
                        + int(mask.size)                                 # int8 mask read
                        + BH * Sq * (Dv + Sk) * itemsize),               # ctx + weights writes
    )

    ctx, w = pl.pallas_call(
        _sdpa_kernel,
        out_shape=(
            jax.ShapeDtypeStruct((BH, Sq, Dv), out_dtype),
            jax.ShapeDtypeStruct((BH, Sq, Sk), out_dtype),
        ),
        grid_spec=pltpu.PrefetchScalarGridSpec(
            num_scalar_prefetch=0,
            grid=grid,
            in_specs=[
                pl.BlockSpec((hb, tq, Dk), lambda b, qi: (b, qi, 0)),   # Q
                pl.BlockSpec((hb, Sk, Dk), lambda b, qi: (b, 0, 0)),    # K (reused over qi)
                pl.BlockSpec((hb, Sk, Dv), lambda b, qi: (b, 0, 0)),    # V (reused over qi)
                mask_spec,                                              # mask (int8)
            ],
            out_specs=[
                pl.BlockSpec((hb, tq, Dv), lambda b, qi: (b, qi, 0)),   # context
                pl.BlockSpec((hb, tq, Sk), lambda b, qi: (b, qi, 0)),   # weights
            ],
        ),
        compiler_params=pltpu.CompilerParams(
            dimension_semantics=("parallel", "parallel"),
            vmem_limit_bytes=_VMEM_LIMIT_BYTES,
        ),
        cost_estimate=cost,
    )(q, k, v, mask)

    return ctx.reshape(B, H, Sq, Dv), w.reshape(B, H, Sq, Sk)


def _reference(Q, K, V, attn_mask):
    scores = jnp.einsum("bhqd,bhkd->bhqk", Q, K) / math.sqrt(d_k)
    scores = jnp.where(jnp.asarray(attn_mask) != 0, -1.0e9, scores)
    weights = jax.nn.softmax(scores, axis=-1)
    context = jnp.einsum("bhqk,bhkd->bhqd", weights, V)
    return context, weights


if __name__ == "__main__":
    key = jax.random.PRNGKey(0)
    kq, kk, kv = jax.random.split(key, 3)

    B, H, S = 2, 4, 8  # small shapes; d_k = 64 fixed by the module
    Q = jax.random.normal(kq, (B, H, S, d_k), dtype=jnp.float32)
    K = jax.random.normal(kk, (B, H, S, d_k), dtype=jnp.float32)
    V = jax.random.normal(kv, (B, H, S, d_k), dtype=jnp.float32)

    # Causal mask (True => masked), as the GPT model would use.
    causal = jnp.triu(jnp.ones((S, S), dtype=jnp.bool_), k=1)

    ref_ctx, ref_w = _reference(Q, K, V, causal)

    # Shared-mask fast path (single [S, S] plane, no BH duplication in HBM).
    ctx, w = scaled_dot_product_attention(Q, K, V, causal)
    jax.block_until_ready((ctx, w))
    assert jnp.allclose(ctx, ref_ctx, atol=2e-2, rtol=2e-2), "context mismatch (shared mask)"
    assert jnp.allclose(w, ref_w, atol=2e-2, rtol=2e-2), "weights mismatch (shared mask)"

    # Fallback path: fully materialized per-(batch, head) mask.
    attn_mask_full = jnp.broadcast_to(causal, (B, H, S, S))
    ctx2, w2 = scaled_dot_product_attention(Q, K, V, attn_mask_full)
    jax.block_until_ready((ctx2, w2))
    assert jnp.allclose(ctx2, ref_ctx, atol=2e-2, rtol=2e-2), "context mismatch (full mask)"
    assert jnp.allclose(w2, ref_w, atol=2e-2, rtol=2e-2), "weights mismatch (full mask)"

    print("KERNEL_OK")
</pallas_src>

<mosaic_0001>
module attributes {stable_mosaic.version = 11 : i64} {
  func.func @_sdpa_kernel(%arg0: i32, %arg1: i32, %arg2: memref<4x8x64xf32, #tpu.memory_space<vmem>>, %arg3: memref<4x8x64xf32, #tpu.memory_space<vmem>>, %arg4: memref<4x8x64xf32, #tpu.memory_space<vmem>>, %arg5: memref<8x8xi8, #tpu.memory_space<vmem>>, %arg6: memref<4x8x64xf32, #tpu.memory_space<vmem>>, %arg7: memref<4x8x8xf32, #tpu.memory_space<vmem>>) attributes {dimension_semantics = [#tpu.dimension_semantics<parallel>, #tpu.dimension_semantics<parallel>], iteration_bounds = array<i64: 2, 1>, scalar_prefetch = 0 : i64, scratch_operands = 0 : i64, tpu.core_type = #tpu.core_type<tc>, window_params = [{transform_indices = @transform_0, window_bounds = array<i64: 4, 8, 64>}, {transform_indices = @transform_1, window_bounds = array<i64: 4, 8, 64>}, {transform_indices = @transform_2, window_bounds = array<i64: 4, 8, 64>}, {transform_indices = @transform_3, window_bounds = array<i64: 8, 8>}, {transform_indices = @transform_4, window_bounds = array<i64: 4, 8, 64>}, {transform_indices = @transform_5, window_bounds = array<i64: 4, 8, 8>}]} {
    %c0 = arith.constant 0 : index
    %c0_0 = arith.constant 0 : index
    %c0_1 = arith.constant 0 : index
    %0 = vector.load %arg2[%c0, %c0_0, %c0_1] : memref<4x8x64xf32, #tpu.memory_space<vmem>>, vector<4x8x64xf32>
    %cst = arith.constant 1.250000e-01 : f32
    %1 = vector.broadcast %cst : f32 to vector<4x8x64xf32>
    %2 = arith.mulf %0, %1 : vector<4x8x64xf32>
    %3 = arith.truncf %2 : vector<4x8x64xf32> to vector<4x8x64xbf16>
    %c0_2 = arith.constant 0 : index
    %c0_3 = arith.constant 0 : index
    %c0_4 = arith.constant 0 : index
    %4 = vector.load %arg3[%c0_2, %c0_3, %c0_4] : memref<4x8x64xf32, #tpu.memory_space<vmem>>, vector<4x8x64xf32>
    %5 = arith.truncf %4 : vector<4x8x64xf32> to vector<4x8x64xbf16>
    %c0_5 = arith.constant 0 : index
    %c0_6 = arith.constant 0 : index
    %6 = vector.load %arg5[%c0_5, %c0_6] : memref<8x8xi8, #tpu.memory_space<vmem>>, vector<8x8xi8>
    "tpu.trace_start"() <{level = 10 : i32, message = "hqd,hkd->hqk"}> : () -> ()
    %cst_7 = arith.constant dense<0.000000e+00> : vector<4x8x8xf32>
    %7 = tpu.matmul %3, %5, %cst_7 {dimension_numbers = #tpu.dot_dimension_numbers<[2], [2], [1], [1], [0, 0, 0, 1, 1, 1], [0], [0]>} : vector<4x8x64xbf16>, vector<4x8x64xbf16>, vector<4x8x8xf32> -> vector<4x8x8xf32>
    "tpu.trace_stop"() : () -> ()
    %cst_8 = arith.constant dense<0xFF800000> : vector<4x8xf32>
    %8 = vector.multi_reduction <maximumf>, %7, %cst_8 [2] : vector<4x8x8xf32> to vector<4x8xf32>
    %9 = vector.shape_cast %8 : vector<4x8xf32> to vector<4x8x1xf32>
    %10 = vector.broadcast %9 : vector<4x8x1xf32> to vector<4x8x8xf32>
    %11 = arith.subf %7, %10 : vector<4x8x8xf32>
    %12 = math.exp %11 : vector<4x8x8xf32>
    %c0_i8 = arith.constant 0 : i8
    %13 = vector.broadcast %c0_i8 : i8 to vector<8x8xi8>
    %14 = arith.cmpi ne, %6, %13 : vector<8x8xi8>
    %cst_9 = arith.constant 0.000000e+00 : f32
    %15 = vector.shape_cast %14 : vector<8x8xi1> to vector<1x8x8xi1>
    %16 = vector.broadcast %15 : vector<1x8x8xi1> to vector<4x8x8xi1>
    %17 = vector.broadcast %cst_9 : f32 to vector<4x8x8xf32>
    %18 = arith.select %16, %17, %12 : vector<4x8x8xi1>, vector<4x8x8xf32>
    %cst_10 = arith.constant dense<0.000000e+00> : vector<4x8xf32>
    %19 = vector.multi_reduction <add>, %18, %cst_10 [2] : vector<4x8x8xf32> to vector<4x8xf32>
    %20 = vector.shape_cast %19 : vector<4x8xf32> to vector<4x8x1xf32>
    %21 = tpu.reciprocal %20 {approx = true} : vector<4x8x1xf32> -> vector<4x8x1xf32>
    %22 = vector.broadcast %21 : vector<4x8x1xf32> to vector<4x8x8xf32>
    %23 = arith.mulf %18, %22 : vector<4x8x8xf32>
    %c0_11 = arith.constant 0 : index
    %c0_12 = arith.constant 0 : index
    %c0_13 = arith.constant 0 : index
    %24 = vector.load %arg4[%c0_11, %c0_12, %c0_13] : memref<4x8x64xf32, #tpu.memory_space<vmem>>, vector<4x8x64xf32>
    %25 = arith.truncf %24 : vector<4x8x64xf32> to vector<4x8x64xbf16>
    %26 = arith.truncf %23 : vector<4x8x8xf32> to vector<4x8x8xbf16>
    "tpu.trace_start"() <{level = 10 : i32, message = "hqk,hkd->hqd"}> : () -> ()
    %cst_14 = arith.constant dense<0.000000e+00> : vector<4x8x64xf32>
    %27 = tpu.matmul %26, %25, %cst_14 {dimension_numbers = #tpu.dot_dimension_numbers<[2], [1], [1], [2], [0, 0, 0, 1, 1, 2], [0], [0]>} : vector<4x8x8xbf16>, vector<4x8x64xbf16>, vector<4x8x64xf32> -> vector<4x8x64xf32>
    "tpu.trace_stop"() : () -> ()
    %c0_15 = arith.constant 0 : index
    %c0_16 = arith.constant 0 : index
    %c0_17 = arith.constant 0 : index
    %28 = vector.load %arg6[%c0_15, %c0_16, %c0_17] : memref<4x8x64xf32, #tpu.memory_space<vmem>>, vector<4x8x64xf32>
    tpu.vector_store %arg6[%c0_15, %c0_16, %c0_17], %27 {strides = array<i32>} : memref<4x8x64xf32, #tpu.memory_space<vmem>>, vector<4x8x64xf32>,
    %c0_18 = arith.constant 0 : index
    %c0_19 = arith.constant 0 : index
    %c0_20 = arith.constant 0 : index
    %29 = vector.load %arg7[%c0_18, %c0_19, %c0_20] : memref<4x8x8xf32, #tpu.memory_space<vmem>>, vector<4x8x8xf32>
    tpu.vector_store %arg7[%c0_18, %c0_19, %c0_20], %23 {strides = array<i32>} : memref<4x8x8xf32, #tpu.memory_space<vmem>>, vector<4x8x8xf32>,
    return
  }
  func.func @transform_0(%arg0: i32, %arg1: i32) -> (i32, i32, i32) {
    %c0_i32 = arith.constant 0 : i32
    %c0_i32_0 = arith.constant 0 : i32
    return %arg0, %arg1, %c0_i32 : i32, i32, i32
  }
  func.func @transform_1(%arg0: i32, %arg1: i32) -> (i32, i32, i32) {
    %c0_i32 = arith.constant 0 : i32
    %c0_i32_0 = arith.constant 0 : i32
    %c0_i32_1 = arith.constant 0 : i32
    return %arg0, %c0_i32, %c0_i32_0 : i32, i32, i32
  }
  func.func @transform_2(%arg0: i32, %arg1: i32) -> (i32, i32, i32) {
    %c0_i32 = arith.constant 0 : i32
    %c0_i32_0 = arith.constant 0 : i32
    %c0_i32_1 = arith.constant 0 : i32
    return %arg0, %c0_i32, %c0_i32_0 : i32, i32, i32
  }
  func.func @transform_3(%arg0: i32, %arg1: i32) -> (i32, i32) {
    %c0_i32 = arith.constant 0 : i32
    %c0_i32_0 = arith.constant 0 : i32
    return %arg1, %c0_i32 : i32, i32
  }
  func.func @transform_4(%arg0: i32, %arg1: i32) -> (i32, i32, i32) {
    %c0_i32 = arith.constant 0 : i32
    %c0_i32_0 = arith.constant 0 : i32
    return %arg0, %arg1, %c0_i32 : i32, i32, i32
  }
  func.func @transform_5(%arg0: i32, %arg1: i32) -> (i32, i32, i32) {
    %c0_i32 = arith.constant 0 : i32
    %c0_i32_0 = arith.constant 0 : i32
    return %arg0, %arg1, %c0_i32 : i32, i32, i32
  }
}

</mosaic_0001>

<bundles_post_ra>
// kernel: tpu_custom_call.1
= control target key start
LH: loop header
LB: loop body
LE: loop exit
PB: predicated region body
PF: predicated region fallthrough
CT: control target
= control target key end

     0   :  { %s1911_s0 = inlined_call_operand.hbm [shape: f32[8,8,64], index: 0, kind: input, shape index: {}]   ;;  %s1912_s1 = inlined_call_operand.hbm [shape: f32[8,8,64], index: 1, kind: input, shape index: {}]   ;;  %s1913_s2 = inlined_call_operand.hbm [shape: f32[8,8,64], index: 2, kind: input, shape index: {}]   ;;  %s1914_s3 = inlined_call_operand.vmem [shape: s8[8,8], index: 3, kind: input, shape index: {}]   ;;  %s1915_s4 = inlined_call_operand.hbm [shape: f32[8,8,64], index: 4, kind: output, shape index: {0}]   ;;  %s1916_s5 = inlined_call_operand.hbm [shape: f32[8,8,8], index: 5, kind: output, shape index: {1}]  }
   0x1   :  { %1929 = sst [smem:[#allocation20_spill]] %s1912_s1 }
   0x2   :  { %11 = vsyncpa [#allocation3], 0 }
   0x3   :  { %13 = vsyncpa [#allocation3 + $0x1], 0 }
   0x4   :  { %14 = vsyncpa [#allocation6], 0 }
   0x5   :  { %16 = vsyncpa [#allocation6 + $0x1], 0 }
   0x6   :  { %17 = vsyncpa [#allocation4], 0 }
   0x7   :  { %19 = vsyncpa [#allocation4 + $0x1], 0 }
   0x8   :  { %20 = vsyncpa [#allocation10], 0 }
   0x9   :  { %22 = vsyncpa [#allocation10 + $0x1], 0  ;;  %s1512_s18 = smov 0   ;;  %s1514_s19 = smov 0  }
   0xa   :  { %s1516_s20 = smov 0   ;;  %s1518_s21 = smov 0  }
   0xb   :  { %s1520_s22 = smov 0   ;;  %s1522_s23 = smov 0  }
   0xc LB: > { %1930 = sst [smem:[#allocation15_spill]] %s1464_s22  ;;  %s1543_s24 = sadd.s32 4294967295, %s1468_s23   ;;  %s1468_s23 = sphi %s1522_s23, %s28_s23   ;;  %s1464_s22 = sphi %s1520_s22, %s1959_s22   ;;  %s1460_s21 = sphi %s1518_s21, %s1958_s21   ;;  %s1456_s20 = sphi %s1516_s20, %s1962_s20   ;;  %s1452_s19 = sphi %s1514_s19, %s1961_s19   ;;  %s1448_s18 = sphi %s1512_s18, %s1960_s18  }
   0xd   : > { %1931 = sst [smem:[#allocation16_spill]] %s1468_s23  ;;  %s1056_s25 = sadd.s32 4294967294, %s1468_s23  }
   0xe   : > { %s40_s26 = sadd.s32 1, %s1464_s22  ;;  %s49_s27 = sadd.s32 1, %s1456_s20 }
   0xf   : > { %p42_p0 = scmp.ge.s32.totalorder %s40_s26, 2  ;;  %p56_p1 = scmp.ne.s32.totalorder %s1456_s20, %s1452_s19 }
  0x10   : > { %p57_p2 = scmp.eq.s32.totalorder %s1468_s23, 0  ;;  %p62_p3 = scmp.ne.s32.totalorder %s1452_s19, %s1448_s18 }
  0x11   : > { %s1964_s26 = smov (%p42_p0, %s40_s26), 0  ;;  %p63_p5 = scmp.eq.s32.totalorder %s1543_s24, 0 }
  0x12   : > { %1932 = sst [smem:[#allocation17_spill]] %s1964_s26  ;;  %p1555_p4 = por %p57_p2, %p56_p1 }
  0x13   : > { %s44_s29 = ssub.s32 %s1464_s22, %s1964_s26  ;;  %p166_p6 = scmp.eq.s32.totalorder %s1543_s24, 1 }
  0x14   : > { %p47_p7 = scmp.eq.s32.totalorder %s44_s29, 0  ;;  %p1563_p8 = por %p63_p5, %p62_p3 }
  0x15   : > { %p1567_p9 = por %p166_p6, %p56_p1  ;;  %p172_p10 = scmp.eq.s32.totalorder %s1056_s25, 1 }
  0x16   : > { %s1934_s30 = scalar_select %p1563_p8, 1, 0 }
  0x17   : > { %s1935_s6 = scalar_select %p1567_p9, 1, 0 }
  0x18   : > { %s1572_s7 = scalar_select %p47_p7, %s1456_s20, %s49_s27  }
  0x19   : > { %p1574_p11 = por %p172_p10, %p62_p3  ;;  %p1187_p13 = scmp.lt.s32.totalorder %s1468_s23, 2 }
  0x1a   : > { %1936 = sst [smem:[#allocation18_spill]] %s1572_s7  ;;  %s1917_s9 = sand.u32 1, %s1456_s20  }
  0x1b   : > { %s1937_s8 = scalar_select %p1574_p11, 1, 0 }
  0x1c   : > { %s1583_s10 = sshll.u32 %s1917_s9, 5  ;;  %s1586_s11 = sshll.u32 %s1464_s22, 9 }
  0x1d   : > { %1938 = sst [smem:[#allocation19_spill]] %s1937_s8  ;;  %p1590_p0 = pnand %p1187_p13, %p1555_p4 }
  0x1e   : > { %s249_s13 = sand.u32 1, %s1468_s23   ;;  %s1940_s1 = sld [smem:[#allocation20_spill]] }
  0x1f   : > { %s253_s17 = scalar_lea.vmem [#allocation5], %s1583_s10  ;;  %s1606_s27 = scalar_lea.sflag [#allocation6], %s249_s13 }
  0x20   : > { %s260_s25 = sshll.u32 %s253_s17, 4  ;;  %p1612_p4 = pneg %p1590_p0  ;;  %s1603_s25 = int_to_ptr.vmem [resolvable:$true] %s260_s25 }
  0x24   : > { %s1599_s16 = scalar_lea.hbm %s1940_s1, %s1586_s11  ;;  %s1265_s17 = scalar_lea.hbm %s1940_s1, 1024 }
  0x25   : > { %s1260_s28 = scalar_lea.hbm %s1599_s16, 512  ;;  %p1266_p7 = scmp.lt.u32.totalorder %s1599_s16, %s1940_s1 }
  0x26   : > { %p1261_p3 = scmp.ne.s32.totalorder %s1599_s16, %s1260_s28  ;;  %p1267_p10 = scmp.lt.u32.totalorder %s1265_s17, %s1260_s28 }
  0x27   : > { %p1269_p12 = scmp.lt.u32.totalorder %s1260_s28, %s1599_s16 }
  0x28   : > { %p1263_p5 = pnand %p1612_p4, %p1261_p3  ;;  %p1268_p13 = por %p1267_p10, %p1266_p7 }
  0x2a   : > { %p1264_p6 = pneg %p1263_p5  ;;  %p1270_p1 = por %p1269_p12, %p1268_p13 }
  0x2c   : > { %p1271_p2 = pnand %p1270_p1, %p1264_p6 }
  0x2e   : > { %1274 = shalt.err (!%p1271_p2)
}
  0x2f   : > { %s1275_s13 = scalar_lea.vmem %s1603_s25, 512  ;;  %s1470_s14 = smov [#allocation5]  }
  0x30   : > { %p1276_p3 = scmp.ne.s32.totalorder %s1603_s25, %s1275_s13  ;;  %s1280_s15 = sshll.u32 %s1470_s14, 4  ;;  %s1281_s15 = int_to_ptr.vmem [resolvable:$false] %s1280_s15 }
  0x31   : > { %s1282_s26 = scalar_lea.vmem %s1281_s15, 1024  ;;  %p1283_p9 = scmp.lt.s32.totalorder %s1603_s25, %s1281_s15 }
  0x32   : > { %p1278_p5 = pnand %p1276_p3, %p1612_p4  ;;  %p1284_p8 = scmp.lt.s32.totalorder %s1282_s26, %s1275_s13 }
  0x34   : > { %p1279_p11 = pneg %p1278_p5  ;;  %p1285_p7 = por %p1284_p8, %p1283_p9 }
  0x36   : > { %p1286_p10 = pnand %p1285_p7, %p1279_p11 }
  0x38   : > { %1289 = shalt.err (!%p1286_p10)
}
  0x39   : > { %s1921_s9 = smov 128   ;;  %s1923_s28 = smov 8  }
  0x3a   : > { %1176 = dma.hbm_to_vmem [thread:$0]  (!%p1590_p0), %s1599_s16, 512, %s1603_s25, %s1606_s27, %s1921_s9, %s1921_s9, %s1923_s28  }
  0x3b   : > { %p1942_p8 = scmp.lt.s32.totalorder %s1468_s23, 3  ;;  %p1943_p9 = scmp.ge.s32.totalorder %s1468_s23, 1 }
  0x3c   : > { %s1651_s15 = scalar_lea.hbm %s1911_s0, %s1586_s11  ;;  %s231_s26 = scalar_lea.vmem [#allocation2], %s1583_s10 }
  0x3d   : > { %p1643_p11 = pnand %p1943_p9, %p1942_p8  ;;  %s239_s1 = sshll.u32 %s231_s26, 4  ;;  %s1654_s1 = int_to_ptr.vmem [resolvable:$true] %s239_s1 }
  0x3e   : > { %s1660_s9 = scalar_lea.hbm %s1913_s2, %s1586_s11  ;;  %s1945_s28 = sand.u32 1, %s1456_s20  }
  0x3f   : > { %s1944_s17 = scalar_select %p1643_p11, 1, 0 }
  0x40   : > { %s1664_s22 = scalar_lea.sflag [#allocation3], %s1945_s28  ;;  %s1290_s7 = scalar_lea.hbm %s1651_s15, 512 }
  0x41   : > { %p1291_p12 = scmp.ne.s32.totalorder %s1651_s15, %s1290_s7  ;;  %s1295_s23 = scalar_lea.hbm %s1911_s0, 1024 }
  0x42   : > { %p1296_p6 = scmp.lt.u32.totalorder %s1651_s15, %s1911_s0  ;;  %p1297_p13 = scmp.lt.u32.totalorder %s1295_s23, %s1290_s7 }
  0x43   : > { %p1293_p1 = pnand %p1291_p12, %p1612_p4  ;;  %p1299_p5 = scmp.lt.u32.totalorder %s1290_s7, %s1651_s15 }
  0x44   : > { %p1298_p3 = por %p1297_p13, %p1296_p6 }
  0x45   : > { %p1294_p2 = pneg %p1293_p1 }
  0x46   : > { %p1300_p7 = por %p1299_p5, %p1298_p3 }
  0x48   : > { %p1301_p10 = pnand %p1300_p7, %p1294_p2 }
  0x4a   : > { %1304 = shalt.err (!%p1301_p10)
}
  0x4b   : > { %s1305_s11 = scalar_lea.vmem %s1654_s1, 512  ;;  %s1473_s28 = smov [#allocation2]  }
  0x4c   : > { %p1306_p8 = scmp.ne.s32.totalorder %s1654_s1, %s1305_s11  ;;  %s1310_s16 = sshll.u32 %s1473_s28, 4  ;;  %s1311_s16 = int_to_ptr.vmem [resolvable:$false] %s1310_s16 }
  0x4d   : > { %s1312_s8 = scalar_lea.vmem %s1311_s16, 1024  ;;  %p1313_p1 = scmp.lt.s32.totalorder %s1654_s1, %s1311_s16 }
  0x4e   : > { %p1308_p9 = pnand %p1306_p8, %p1612_p4  ;;  %p1314_p11 = scmp.lt.s32.totalorder %s1312_s8, %s1305_s11 }
  0x50   : > { %p1309_p12 = pneg %p1308_p9  ;;  %p1315_p6 = por %p1314_p11, %p1313_p1 }
  0x52   : > { %p1316_p13 = pnand %p1315_p6, %p1309_p12 }
  0x54   : > { %1319 = shalt.err (!%p1316_p13)
}
  0x55   : > { %s1946_s23 = smov 8   ;;  %s1947_s7 = smov 128  }
  0x56   : > { %1173 = dma.hbm_to_vmem [thread:$0]  (!%p1590_p0), %s1651_s15, 512, %s1654_s1, %s1664_s22, %s1947_s7, %s1947_s7, %s1946_s23  }
  0x57   : > { %s274_s25 = scalar_lea.vmem [#allocation7], %s1583_s10  ;;  %s1320_s14 = scalar_lea.hbm %s1660_s9, 512 }
  0x58   : > { %s281_s13 = sshll.u32 %s274_s25, 4  ;;  %p1321_p11 = scmp.ne.s32.totalorder %s1660_s9, %s1320_s14  ;;  %s1692_s13 = int_to_ptr.vmem [resolvable:$true] %s281_s13 }
  0x59   : > { %s1325_s28 = scalar_lea.hbm %s1913_s2, 1024  ;;  %p1326_p5 = scmp.lt.u32.totalorder %s1660_s9, %s1913_s2 }
  0x5a   : > { %p1323_p2 = pnand %p1321_p11, %p1612_p4  ;;  %p1327_p7 = scmp.lt.u32.totalorder %s1325_s28, %s1320_s14 }
  0x5b   : > { %p1329_p8 = scmp.lt.u32.totalorder %s1320_s14, %s1660_s9 }
  0x5c   : > { %p1324_p3 = pneg %p1323_p2  ;;  %p1328_p10 = por %p1327_p7, %p1326_p5 }
  0x5e   : > { %p1330_p9 = por %p1329_p8, %p1328_p10 }
  0x60   : > { %p1331_p12 = pnand %p1330_p9, %p1324_p3 }
  0x62   : > { %1334 = shalt.err (!%p1331_p12)
}
  0x63   : > { %s1335_s1 = scalar_lea.vmem %s1692_s13, 512  ;;  %s1474_s22 = smov [#allocation7]  }
  0x64   : > { %p1336_p1 = scmp.ne.s32.totalorder %s1692_s13, %s1335_s1  ;;  %s1340_s10 = sshll.u32 %s1474_s22, 4  ;;  %s1341_s10 = int_to_ptr.vmem [resolvable:$false] %s1340_s10 }
  0x65   : > { %s1342_s15 = scalar_lea.vmem %s1341_s10, 1024  ;;  %p1343_p11 = scmp.lt.s32.totalorder %s1692_s13, %s1341_s10 }
  0x66   : > { %p1338_p6 = pnand %p1336_p1, %p1612_p4  ;;  %p1344_p2 = scmp.lt.s32.totalorder %s1342_s15, %s1335_s1 }
  0x68   : > { %p1339_p13 = pneg %p1338_p6  ;;  %p1345_p5 = por %p1344_p2, %p1343_p11 }
  0x6a   : > { %p1346_p7 = pnand %p1345_p5, %p1339_p13 }
  0x6c   : > { %1349 = shalt.err (!%p1346_p7)
}
  0x6d   : > { %1179 = dma.hbm_to_vmem [thread:$0]  (!%p1590_p0), %s1660_s9, 512, %s1692_s13, %s1606_s27, %s1947_s7, %s1947_s7, %s1946_s23  }
  0x6e   : > { %p1948_p4 = scmp.ne.s32.totalorder %s1944_s17, 0 }
  0x6f   : > { %s1722_s29 = sand.u32 (!%p1948_p4), 1, %s1452_s19   ;;  %p1949_p3 = scmp.ne.s32.totalorder (!%p1948_p4), %s1934_s30, 0 }
  0x70   : > { %293 = sbr.rel (%p1948_p4) target bundleno = 902 (0x386), region = 36  ;;  %s1725_s25 = sshll.u32 (!%p1948_p4), %s1722_s29, 5 }
  0x71   : > { %s296_s12 = scalar_lea.sflag (!%p1948_p4), [#allocation3], %s1722_s29  ;;  %s1729_s14 = scalar_lea.vmem (!%p1948_p4), [#allocation2], %s1725_s25 }
  0x77   : > { %1431 = dma.done.wait (%p1949_p3), %s296_s12, 512  }
  0x78   : > { %1433 = vsyncadd (%p1949_p3), %s296_s12, 4294966784  ;;  %s304_s27 = sand.u32 1, %s1543_s24   ;;  %s308_s17 = scalar_lea.vmem [#allocation5], %s1725_s25 }
  0x79   : > { %s305_s9 = scalar_lea.sflag [#allocation6], %s304_s27 }
  0x7a   : > { %1435 = dma.done.wait (%p1949_p3), %s305_s9, 1024  }
  0x7b   : > { %1437 = vsyncadd (%p1949_p3), %s305_s9, 4294966272  ;;  %v1475_v0 = vmov 0.0   ;;  %vm1476_vm0 = vmmov 0   ;;  %v387_v1 = vld [vmem:[%s308_s17] sm:$0xff]  ;;  %vm396_vm1 = vcmask 523264   ;;  %v388_v2 = vld [vmem:[%s308_s17 + $0x8] sm:$0xff] }
  0x7c   : > { %1112 = vmatprep.subr.bf16.mxu0 %v1475_v0  ;;  %1118 = vmatprep.subr.bf16.mxu1 %v1475_v0  ;;  %v375_v3 = vld [vmem:[%s1729_s14] sm:$0xff]  ;;  %v391_v4 = vpack.c.bf16 %v387_v1, %v387_v1  ;;  %v392_v5 = vpack.c.bf16 %v388_v2, %v388_v2  ;;  %v376_v6 = vld [vmem:[%s1729_s14 + $0x8] sm:$0xff]  ;;  %v389_v7 = vld [vmem:[%s308_s17 + $0x10] sm:$0xff]  ;;  %vm581_vm2 = vcmask 64512   ;;  %v1477_v51 = vmov 0   ;;  %s317_s23 = scalar_lea.vmem [#allocation7], %s1725_s25 }
  0x7d   : > { %1114 = vmatprep.mubr.msk.bf16.mxu0 %vm1476_vm0, %v1475_v0  ;;  %1120 = vmatprep.mubr.msk.bf16.mxu1 %vm1476_vm0, %v1475_v0  ;;  %v390_v8 = vld [vmem:[%s308_s17 + $0x18] sm:$0xff]  ;;  %v379_v11 = vmul.f32 0.125, %v375_v3  ;;  %v380_v12 = vmul.f32 0.125, %v376_v6  ;;  %v393_v13 = vpack.c.bf16 %v389_v7, %v389_v7  ;;  %v377_v17 = vld [vmem:[%s1729_s14 + $0x10] sm:$0xff]  ;;  %v395_v46 = vld [vmem:[%s1914_s3] sm:$0x3] }
  0x7e   : > { %v401_v9 = vsel %vm396_vm1, %v391_v4, 0  ;;  %v447_v10 = vsel %vm396_vm1, %v392_v5, 0  ;;  %v394_v14 = vpack.c.bf16 %v390_v8, %v390_v8  ;;  %v378_v18 = vld [vmem:[%s1729_s14 + $0x18] sm:$0xff]  ;;  %v381_v21 = vmul.f32 0.125, %v377_v17  ;;  %v638_v17 = vld [vmem:[%s317_s23 + $0x10] sm:$0xff]  ;;  %s362_s7 = scalar_lea.vmem [#allocation9], %s1725_s25 }
  0x7f   : > { %1113 = vmatpush3.bf16.xpose.msra.mxu0 %v401_v9  ;;  %1119 = vmatpush3.bf16.xpose.msra.mxu1 %v447_v10  ;;  %v383_v15 = vpack.c.bf16 %v379_v11, %v379_v11  ;;  %v384_v16 = vpack.c.bf16 %v380_v12, %v380_v12  ;;  %v493_v19 = vsel %vm396_vm1, %v393_v13, 0  ;;  %v382_v22 = vmul.f32 0.125, %v378_v18  ;;  %v636_v11 = vld [vmem:[%s317_s23] sm:$0xff]  ;;  %s1094_s13 = sshll.u32 %s1460_s21, 9  ;;  %s878_s26 = sshll.u32 %s362_s7, 4  ;;  %s1818_s26 = int_to_ptr.vmem [resolvable:$true] %s878_s26 }
  0x80   : > { %1124 = vmatprep.subr.bf16.mxu0 %v1475_v0  ;;  %1130 = vmatprep.subr.bf16.mxu1 %v1475_v0  ;;  %v539_v20 = vsel %vm396_vm1, %v394_v14, 0  ;;  %v385_v23 = vpack.c.bf16 %v381_v21, %v381_v21  ;;  %vm606_vm3 = vnez %v395_v46  ;;  %v640_v12 = vpack.c.bf16 %v636_v11, %v636_v11  ;;  %v637_v14 = vld [vmem:[%s317_s23 + $0x8] sm:$0xff]  ;;  %s1816_s16 = scalar_lea.hbm %s1916_s5, %s1094_s13  ;;  %s847_s8 = scalar_lea.sflag [#allocation10], %s1722_s29 }
  0x81   : > { %v386_v24 = vpack.c.bf16 %v382_v22, %v382_v22  ;;  %v607_v52 = vsel %vm606_vm3, 16843009, %v1477_v51  ;;  %vm651_vm5 = vcmask 1043456   ;;  %v642_v18 = vpack.c.bf16 %v638_v17, %v638_v17  ;;  %s1350_s1 = scalar_lea.vmem %s1818_s26, 512  ;;  %p1952_p10 = scmp.ne.s32.totalorder %s1935_s6, 0 }
  0x82   : > { %v608_v56 = vunpack.c.0.s8 %v607_v52  ;;  %v653_v13 = vsel %vm651_vm5, %v640_v12, 0  ;;  %p1351_p0 = scmp.ne.s32.totalorder %s1818_s26, %s1350_s1  ;;  %s1478_s22 = smov [#allocation9]  }
  0x83   : > { %s1354_s10 = sshll.u32 %s1478_s22, 4  ;;  %s1355_s10 = int_to_ptr.vmem [resolvable:$false] %s1354_s10 }
  0x84   : > { %vm1778_vm4 = vcmp.ne.s32.totalorder %v608_v56, 0  ;;  %p1352_p8 = pnand %p1351_p0, %p1952_p10  ;;  %s1356_s15 = scalar_lea.vmem %s1355_s10, 1024 }
  0x85   : > { %p1357_p12 = scmp.lt.s32.totalorder %s1818_s26, %s1355_s10  ;;  %p1358_p1 = scmp.lt.s32.totalorder %s1356_s15, %s1350_s1 }
  0x86   : > { %1115 = vmatmul.mubr.msk.bf16.vlgmr.msra.gmra.mrb[0].mxu0 %vm396_vm1, %v383_v15  ;;  %1121 = vmatmul.mubr.msk.bf16.vlgmr.msra.gmra.mrb[0].mxu1 %vm396_vm1, %v384_v16  ;;  %v641_v15 = vpack.c.bf16 %v637_v14, %v637_v14  ;;  %p1353_p9 = pneg %p1352_p8 }
  0x87   : > { %1125 = vmatpush3.bf16.xpose.msra.mxu0 %v493_v19  ;;  %1131 = vmatpush3.bf16.xpose.msra.mxu1 %v539_v20  ;;  %v745_v19 = vsel %vm651_vm5, %v642_v18, 0  ;;  %v639_v20 = vld [vmem:[%s317_s23 + $0x18] sm:$0xff]  ;;  %p1359_p6 = por %p1358_p1, %p1357_p12 }
  0x88   : > { %1126 = vmatprep.mubr.msk.bf16.mxu0 %vm1476_vm0, %v1475_v0  ;;  %1132 = vmatprep.mubr.msk.bf16.mxu1 %vm1476_vm0, %v1475_v0  ;;  %v699_v16 = vsel %vm651_vm5, %v641_v15, 0  ;;  %v643_v21 = vpack.c.bf16 %v639_v20, %v639_v20 }
  0x89   : > { %1136 = vmatprep.subr.bf16.mxu0 %v1475_v0  ;;  %1142 = vmatprep.subr.bf16.mxu1 %v1475_v0  ;;  %p1360_p13 = pnand %p1359_p6, %p1353_p9 }
  0x8a   : > { %v791_v22 = vsel %vm651_vm5, %v643_v21, 0 }
  0x8e   : > { %1127 = vmatmul.mubr.msk.bf16.vlgmr.msra.gmra.mrb[4].mxu0 %vm396_vm1, %v385_v23  ;;  %1133 = vmatmul.mubr.msk.bf16.vlgmr.msra.gmra.mrb[4].mxu1 %vm396_vm1, %v386_v24 }
  0x8f   : > { %1138 = vmatprep.mubr.msk.bf16.mxu0 %vm1476_vm0, %v1475_v0  ;;  %1144 = vmatprep.mubr.msk.bf16.mxu1 %vm1476_vm0, %v1475_v0 }
  0x90   : > { %1137 = vmatpush3.bf16.msra.mxu0 %v653_v13  ;;  %1143 = vmatpush3.bf16.msra.mxu1 %v699_v16 }
  0x91   : > { %1148 = vmatprep.subr.bf16.mxu0 %v1475_v0  ;;  %1154 = vmatprep.subr.bf16.mxu1 %v1475_v0 }
 0x159   : > { %v437_v25 = vpop.f32.mrb[0].mxu0  ;;  %v483_v26 = vpop.f32.mrb[0].mxu1 }
 0x15a   : > { %v1116_v27 = vpop.f32.mrb[1].mxu0  ;;  %v582_v28 = vsel %vm581_vm2, %v437_v25, -inf  ;;  %v1122_v29 = vpop.f32.mrb[1].mxu1  ;;  %v585_v34 = vsel %vm581_vm2, %v483_v26, -inf }
 0x15b   : > { %583 = vmax.xlane.f32.xlu0 %v582_v28  ;;  %v440_v30 = vpop.f32.mrb[2].mxu0  ;;  %v486_v31 = vpop.f32.mrb[2].mxu1 }
 0x15c   : > { %v1117_v32 = vpop.f32.mrb[3].mxu0  ;;  %v1123_v33 = vpop.f32.mrb[3].mxu1 }
 0x15f   : > { %586 = vmax.xlane.f32.xlu0 %v585_v34 }
 0x161   : > { %v529_v35 = vpop.f32.mrb[4].mxu0  ;;  %v575_v36 = vpop.f32.mrb[4].mxu1 }
 0x162   : > { %v1128_v37 = vpop.f32.mrb[5].mxu0  ;;  %v588_v38 = vsel %vm581_vm2, %v529_v35, -inf  ;;  %v1134_v39 = vpop.f32.mrb[5].mxu1  ;;  %v591_v44 = vsel %vm581_vm2, %v575_v36, -inf }
 0x163   : > { %589 = vmax.xlane.f32.xlu1 %v588_v38  ;;  %v532_v40 = vpop.f32.mrb[6].mxu0  ;;  %v578_v41 = vpop.f32.mrb[6].mxu1 }
 0x164   : > { %v1129_v42 = vpop.f32.mrb[7].mxu0  ;;  %v1135_v43 = vpop.f32.mrb[7].mxu1 }
 0x167   : > { %592 = vmax.xlane.f32.xlu1 %v591_v44 }
 0x1e8   : > { %v584_v45 = vpop.xlane.xlu0 %583 }
 0x1e9   : > { %v594_v47 = vsub.f32 %v437_v25, %v584_v45 }
 0x1eb   : > { %v598_v48 = vmul.f32 1.442695, %v594_v47 }
 0x1ec   : > { %v587_v49 = vpop.xlane.xlu0 %586 }
 0x1ed   : > { %1244 = vpow2.f32 %v598_v48  ;;  %v595_v50 = vsub.f32 %v483_v26, %v587_v49 }
 0x1ef   : > { %v600_v53 = vmul.f32 1.442695, %v595_v50 }
 0x1f0   : > { %v590_v54 = vpop.xlane.xlu1 %589 }
 0x1f1   : > { %1246 = vpow2.f32 %v600_v53  ;;  %v596_v55 = vsub.f32 %v529_v35, %v590_v54 }
 0x1f3   : > { %v602_v57 = vmul.f32 1.442695, %v596_v55 }
 0x1f4   : > { %v593_v58 = vpop.xlane.xlu1 %592 }
 0x1f5   : > { %1248 = vpow2.f32 %v602_v57  ;;  %v597_v59 = vsub.f32 %v575_v36, %v593_v58 }
 0x1f7   : > { %v1245_v61 = vpop.eup %1244  ;;  %v604_v62 = vmul.f32 1.442695, %v597_v59 }
 0x1f8   : > { %v612_v63 = vsel %vm1778_vm4, 0.0, %v1245_v61 }
 0x1f9   : > { %1250 = vpow2.f32 %v604_v62  ;;  %v616_v1 = vsel %vm581_vm2, %v612_v63, 0.0 }
 0x1fa   : > { %617 = vadd.xlane.f32.xlu0 %v616_v1 }
 0x1fb   : > { %v1247_v2 = vpop.eup %1246 }
 0x1fc   : > { %v613_v3 = vsel %vm1778_vm4, 0.0, %v1247_v2 }
 0x1fd   : > { %v619_v4 = vsel %vm581_vm2, %v613_v3, 0.0 }
 0x1fe   : > { %620 = vadd.xlane.f32.xlu1 %v619_v4 }
 0x1ff   : > { %v1249_v5 = vpop.eup %1248 }
 0x200   : > { %v614_v6 = vsel %vm1778_vm4, 0.0, %v1249_v5 }
 0x201   : > { %v622_v7 = vsel %vm581_vm2, %v614_v6, 0.0 }
 0x202   : > { %623 = vadd.xlane.f32.xlu0 %v622_v7 }
 0x203   : > { %v1251_v8 = vpop.eup %1250 }
 0x204   : > { %v615_v9 = vsel %vm1778_vm4, 0.0, %v1251_v8 }
 0x205   : > { %v625_v10 = vsel %vm581_vm2, %v615_v9, 0.0 }
 0x206   : > { %626 = vadd.xlane.f32.xlu1 %v625_v10 }
 0x287   : > { %v618_v23 = vpop.xlane.xlu0 %617 }
 0x288   : > { %1252 = vrcp.f32 %v618_v23 }
 0x28b   : > { %v621_v24 = vpop.xlane.xlu1 %620 }
 0x28c   : > { %1254 = vrcp.f32 %v621_v24 }
 0x28f   : > { %v624_v25 = vpop.xlane.xlu0 %623 }
 0x290   : > { %1256 = vrcp.f32 %v624_v25 }
 0x292   : > { %v1253_v26 = vpop.eup %1252 }
 0x293   : > { %v632_v27 = vmul.f32 %v1253_v26, %v612_v63  ;;  %v627_v28 = vpop.xlane.xlu1 %626 }
 0x294   : > { %1258 = vrcp.f32 %v627_v28 }
 0x295   : > { %837 = vst.msk [vmem:[%s362_s7] sm:$0xff] %vm581_vm2, %v632_v27  ;;  %v644_v29 = vpack.c.bf16 %v632_v27, %v632_v27 }
 0x296   : > { %v1255_v30 = vpop.eup %1254 }
 0x297   : > { %v633_v31 = vmul.f32 %v1255_v30, %v613_v3  ;;  %1139 = vmatmul.mubr.msk.bf16.vlgmr.msra.gmra.mrb[8].mxu0 %vm581_vm2, %v644_v29 }
 0x298   : > { %1149 = vmatpush3.bf16.msra.mxu0 %v745_v19  ;;  %1150 = vmatprep.mubr.msk.bf16.mxu0 %vm1476_vm0, %v1475_v0 }
 0x299   : > { %838 = vst.msk [vmem:[%s362_s7 + $0x8] sm:$0xff] %vm581_vm2, %v633_v31  ;;  %v645_v32 = vpack.c.bf16 %v633_v31, %v633_v31 }
 0x29a   : > { %v1257_v33 = vpop.eup %1256 }
 0x29b   : > { %v634_v34 = vmul.f32 %v1257_v33, %v614_v6  ;;  %1145 = vmatmul.mubr.msk.bf16.vlgmr.msra.gmra.mrb[8].mxu1 %vm581_vm2, %v645_v32 }
 0x29c   : > { %1155 = vmatpush3.bf16.msra.mxu1 %v791_v22  ;;  %1156 = vmatprep.mubr.msk.bf16.mxu1 %vm1476_vm0, %v1475_v0 }
 0x29d   : > { %839 = vst.msk [vmem:[%s362_s7 + $0x10] sm:$0xff] %vm581_vm2, %v634_v34  ;;  %v646_v35 = vpack.c.bf16 %v634_v34, %v634_v34 }
 0x29e   : > { %v1259_v36 = vpop.eup %1258 }
 0x29f   : > { %v635_v37 = vmul.f32 %v1259_v36, %v615_v9  ;;  %1151 = vmatmul.mubr.msk.bf16.vlgmr.msra.gmra.mrb[12].mxu0 %vm581_vm2, %v646_v35 }
 0x2a1   : > { %840 = vst.msk [vmem:[%s362_s7 + $0x18] sm:$0xff] %vm581_vm2, %v635_v37  ;;  %v647_v38 = vpack.c.bf16 %v635_v37, %v635_v37 }
 0x2a3   : > { %1157 = vmatmul.mubr.msk.bf16.vlgmr.msra.gmra.mrb[12].mxu1 %vm581_vm2, %v647_v38 }
 0x2a4   : > { %1363 = shalt.err (!%p1360_p13)
}
 0x2a5   : > { %s1364_s12 = scalar_lea.hbm %s1816_s16, 512  ;;  %s1368_s9 = scalar_lea.hbm %s1916_s5, 1024 }
 0x2a6   : > { %p1365_p11 = scmp.ne.s32.totalorder %s1816_s16, %s1364_s12  ;;  %p1369_p7 = scmp.lt.u32.totalorder %s1816_s16, %s1916_s5 }
 0x2a7   : > { %p1370_p4 = scmp.lt.u32.totalorder %s1368_s9, %s1364_s12  ;;  %p1372_p0 = scmp.lt.u32.totalorder %s1364_s12, %s1816_s16 }
 0x2a8   : > { %p1366_p2 = pnand %p1365_p11, %p1952_p10 }
 0x2a9   : > { %p1371_p3 = por %p1370_p4, %p1369_p7 }
 0x2aa   : > { %p1367_p5 = pneg %p1366_p2 }
 0x2ab   : > { %p1373_p8 = por %p1372_p0, %p1371_p3 }
 0x2ad   : > { %p1374_p9 = pnand %p1373_p8, %p1367_p5 }
 0x2af   : > { %1377 = shalt.err (!%p1374_p9)
}
 0x2b0   : > { %s1479_s30 = smov 128   ;;  %s1480_s23 = smov 8  }
 0x2b1   : > { %1167 = dma.vmem_to_hbm [thread:$0]  (%p1952_p10), %s1818_s26, 512, %s1816_s16, %s847_s8, %s1479_s30, %s1479_s30, %s1480_s23  }
 0x2b2   : > { %s355_s7 = scalar_lea.vmem [#allocation8], %s1725_s25  ;;  %s1858_s28 = scalar_lea.hbm %s1915_s4, %s1094_s13 }
 0x2b3   : > { %s861_s11 = sshll.u32 %s355_s7, 4  ;;  %s842_s16 = scalar_lea.sflag [#allocation4], %s1722_s29  ;;  %s1851_s11 = int_to_ptr.vmem [resolvable:$true] %s861_s11 }
 0x2b4   : > { %s1378_s8 = scalar_lea.vmem %s1851_s11, 512  ;;  %s1481_s1 = smov [#allocation8]  }
 0x2b5   : > { %p1379_p12 = scmp.ne.s32.totalorder %s1851_s11, %s1378_s8  ;;  %s1382_s22 = sshll.u32 %s1481_s1, 4  ;;  %s1383_s22 = int_to_ptr.vmem [resolvable:$false] %s1382_s22 }
 0x2b6   : > { %s1384_s21 = scalar_lea.vmem %s1383_s22, 1024  ;;  %p1385_p13 = scmp.lt.s32.totalorder %s1851_s11, %s1383_s22 }
 0x2b7   : > { %p1380_p1 = pnand %p1379_p12, %p1952_p10  ;;  %p1386_p11 = scmp.lt.s32.totalorder %s1384_s21, %s1378_s8 }
 0x2b9   : > { %p1381_p6 = pneg %p1380_p1  ;;  %p1387_p2 = por %p1386_p11, %p1385_p13 }
 0x2bb   : > { %p1388_p5 = pnand %p1387_p2, %p1381_p6 }
 0x36a   : > { %v689_v0 = vpop.f32.mrb[8].mxu0 }
 0x36b   : > { %833 = vst.msk [vmem:[%s355_s7] sm:$0xff] %vm396_vm1, %v689_v0  ;;  %v1140_v39 = vpop.f32.mrb[9].mxu0 }
 0x36c   : > { %v692_v40 = vpop.f32.mrb[10].mxu0 }
 0x36d   : > { %v1141_v41 = vpop.f32.mrb[11].mxu0 }
 0x36e   : > { %v735_v42 = vpop.f32.mrb[8].mxu1 }
 0x36f   : > { %834 = vst.msk [vmem:[%s355_s7 + $0x8] sm:$0xff] %vm396_vm1, %v735_v42  ;;  %v1146_v43 = vpop.f32.mrb[9].mxu1 }
 0x370   : > { %v738_v44 = vpop.f32.mrb[10].mxu1 }
 0x371   : > { %v1147_v45 = vpop.f32.mrb[11].mxu1 }
 0x372   : > { %v781_v46 = vpop.f32.mrb[12].mxu0 }
 0x373   : > { %835 = vst.msk [vmem:[%s355_s7 + $0x10] sm:$0xff] %vm396_vm1, %v781_v46  ;;  %v1152_v47 = vpop.f32.mrb[13].mxu0 }
 0x374   : > { %v784_v48 = vpop.f32.mrb[14].mxu0 }
 0x375   : > { %v1153_v49 = vpop.f32.mrb[15].mxu0 }
 0x376   : > { %v827_v50 = vpop.f32.mrb[12].mxu1 }
 0x377   : > { %836 = vst.msk [vmem:[%s355_s7 + $0x18] sm:$0xff] %vm396_vm1, %v827_v50  ;;  %v1158_v51 = vpop.f32.mrb[13].mxu1 }
 0x378   : > { %v830_v52 = vpop.f32.mrb[14].mxu1 }
 0x379   : > { %1391 = shalt.err (!%p1388_p5)
}
 0x37a   : > { %s1392_s13 = scalar_lea.hbm %s1858_s28, 512  ;;  %s1396_s12 = scalar_lea.hbm %s1915_s4, 1024 }
 0x37b   : > { %p1393_p7 = scmp.ne.s32.totalorder %s1858_s28, %s1392_s13  ;;  %p1397_p0 = scmp.lt.u32.totalorder %s1858_s28, %s1915_s4 }
 0x37c   : > { %p1398_p8 = scmp.lt.u32.totalorder %s1396_s12, %s1392_s13  ;;  %p1400_p12 = scmp.lt.u32.totalorder %s1392_s13, %s1858_s28 }
 0x37d   : > { %p1394_p4 = pnand %p1393_p7, %p1952_p10 }
 0x37e   : > { %p1399_p9 = por %p1398_p8, %p1397_p0 }
 0x37f   : > { %p1395_p3 = pneg %p1394_p4 }
 0x380   : > { %p1401_p1 = por %p1400_p12, %p1399_p9 }
 0x382   : > { %p1402_p6 = pnand %p1401_p1, %p1395_p3 }
 0x384   : > { %1405 = shalt.err (!%p1402_p6)
}
 0x385   : > { %1166 = dma.vmem_to_hbm [thread:$0]  (%p1952_p10), %s1851_s11, 512, %s1858_s28, %s842_s16, %s1479_s30, %s1479_s30, %s1480_s23   ;;  %v1159_v53 = vpop.f32.mrb[15].mxu1 }
 0x386 PF: > { %s1953_s9 = sld [smem:[#allocation19_spill]]  ;;  %s1954_s17 = sld [smem:[#allocation16_spill]] }
 0x387   : > { %s893_s24 = sand.u32 1, %s1448_s18  }
 0x388   : > { %s894_s7 = scalar_lea.sflag [#allocation4], %s893_s24 }
 0x38c   : > { %p1955_p13 = scmp.ne.s32.totalorder %s1953_s9, 0  ;;  %p1956_p11 = scmp.ge.s32.totalorder %s1954_s17, 2 }
 0x38e   : > { %p1181_p2 = pnand %p1956_p11, %p1955_p13 }
 0x390   : > { %1439 = dma.done.wait (!%p1181_p2), %s894_s7, 512  }
 0x391   : > { %1441 = vsyncadd (!%p1181_p2), %s894_s7, 4294966784  ;;  %s903_s6 = scalar_lea.sflag [#allocation10], %s893_s24 }
 0x392   : > { %1443 = dma.done.wait (!%p1181_p2), %s903_s6, 512  }
 0x393   : > { %1445 = vsyncadd (!%p1181_p2), %s903_s6, 4294966784  ;;  %s28_s23 = sadd.s32 1, %s1954_s17   ;;  %s1957_s29 = sld [smem:[#allocation18_spill]] }
 0x394   : > { %p25_p5 = scmp.ge.s32.totalorder %s28_s23, 4   ;;  %s1958_s21 = sld [smem:[#allocation15_spill]] }
 0x395   : > { %s1959_s22 = sld [smem:[#allocation17_spill]]  ;;  %s1960_s18 = smov %s1452_s19 }
 0x396   : > { %s1961_s19 = smov %s1456_s20  ;;  %27 = sbr.rel (!%p25_p5) target bundleno = 12 (0xc), region = 125 }
 0x399   : > { %s1962_s20 = smov %s1957_s29 }
 0x39d   :  { %908 = vsyncpa [#allocation3], 1 }
 0x39e   :  { %910 = vsyncpa [#allocation3 + $0x1], 1 }
 0x39f   :  { %911 = vsyncpa [#allocation6], 1 }
 0x3a0   :  { %913 = vsyncpa [#allocation6 + $0x1], 1 }
 0x3a1   :  { %914 = vsyncpa [#allocation4], 1 }
 0x3a2   :  { %916 = vsyncpa [#allocation4 + $0x1], 1 }
 0x3a3   :  { %917 = vsyncpa [#allocation10], 1 }
 0x3a4   :  { %919 = vsyncpa [#allocation10 + $0x1], 1 }

</bundles_post_ra>
